<compile_context>
chip_gen: v7x
topology: tpu7x:2x2x1
jax: 0.10.0
libtpu: 0.0.40
codegen_flags: <defaults>
</compile_context>

<pallas_src>
import functools
import math

import jax
import jax.numpy as jnp
from jax import lax
from jax.experimental import pallas as pl
from jax.experimental.pallas import tpu as pltpu

OUT_PAD = 128   # lane-dense padded width of the fc3 / softmax output


# ----------------------------------------------------------------------------
# Fused kernel
# ----------------------------------------------------------------------------

def _fused_cnn_kernel(x_ref, w1_ref, b1_ref, w2_ref, b2_ref,
                      f1w_ref, f1b_ref, f2w_ref, f2b_ref, f3w_ref, f3b_ref,
                      o_ref):
    x = x_ref[...]                                                   # (T, 64) bf16

    # conv1 (1->6, 3x3 valid) + ReLU as a dense bf16 GEMM (f32 accumulate).
    # Columns: c*36 + oh*6 + ow for cols < 216, zero-padded to 256.
    h1 = jnp.dot(x, w1_ref[...], preferred_element_type=jnp.float32)  # (T, 256)
    h1 = jnp.maximum(h1 + b1_ref[...], 0.0)                           # f32 elementwise

    # conv2 (6->16, 3x3 valid) + ReLU as a dense bf16 GEMM; output columns are
    # permuted so the four 64-lane chunks are the 4 candidates of each 2x2
    # pooling window (each chunk in PyTorch flatten (c, i, j) order).
    h2 = jnp.dot(h1.astype(jnp.bfloat16), w2_ref[...],
                 preferred_element_type=jnp.float32)                  # (T, 256)
    h2 = jnp.maximum(h2 + b2_ref[...], 0.0)

    # 2x2 max-pool == elementwise max of the 4 contiguous 64-lane chunks.
    pooled = jnp.maximum(jnp.maximum(h2[:, 0:64], h2[:, 64:128]),
                         jnp.maximum(h2[:, 128:192], h2[:, 192:256]))  # (T, 64) f32

    # fc1 / fc2 (+ReLU) and fc3 (bf16 GEMMs, f32 accum).  Dropout = identity.
    h = jnp.dot(pooled.astype(jnp.bfloat16), f1w_ref[...],
                preferred_element_type=jnp.float32)
    h = jnp.maximum(h + f1b_ref[...], 0.0)                            # (T, 32)
    h = jnp.dot(h.astype(jnp.bfloat16), f2w_ref[...],
                preferred_element_type=jnp.float32)
    h = jnp.maximum(h + f2b_ref[...], 0.0)                            # (T, 32)
    logits = jnp.dot(h.astype(jnp.bfloat16), f3w_ref[...],
                     preferred_element_type=jnp.float32)
    logits = logits + f3b_ref[...]                                    # (T, 128); pads ~ -1e30

    # Softmax over the lane dim (padded classes get exp(~-1e30) == 0).
    z = logits - jnp.max(logits, axis=-1, keepdims=True)
    e = jnp.exp(z)
    o_ref[...] = e / jnp.sum(e, axis=-1, keepdims=True)


# ----------------------------------------------------------------------------
# One-time weight preparation (conv -> dense GEMM matrices, FC transposes)
# ----------------------------------------------------------------------------

def _conv1_as_dense(w, b):
    """w:(6,1,3,3), b:(6,) -> Wd:(64,256), bd:(1,256); col = c*36 + oh*6 + ow (<216)."""
    rows, cols, flat = [], [], []
    for c in range(6):
        for oh in range(6):
            for ow in range(6):
                q = c * 36 + oh * 6 + ow
                for kh in range(3):
                    for kw in range(3):
                        rows.append((oh + kh) * 8 + (ow + kw))
                        cols.append(q)
                        flat.append(c * 9 + kh * 3 + kw)
    vals = w.reshape(-1)[jnp.array(flat)].astype(jnp.float32)
    wd = jnp.zeros((64, 256), jnp.float32).at[jnp.array(rows), jnp.array(cols)].set(vals)
    bd = jnp.zeros((1, 256), jnp.float32).at[0, :216].set(
        jnp.repeat(b.astype(jnp.float32), 36))
    return wd, bd


def _conv2_pool_as_dense(w, b):
    """w:(16,6,3,3), b:(16,) -> Wd:(256,256), bd:(1,256).

    Output column for conv2 pixel (c, oh, ow) is (di*2+dj)*64 + c*4 + i*2 + j
    with oh = 2i+di, ow = 2j+dj, i.e. the 4 chunks of 64 lanes are the 4
    pooling candidates, each in PyTorch flatten (c, i, j) order.  Rows 216..255
    (padding of the conv1 interface) stay zero.
    """
    rows, cols, flat = [], [], []
    for c in range(16):
        for oh in range(4):
            for ow in range(4):
                i, di = oh // 2, oh % 2
                j, dj = ow // 2, ow % 2
                p = (di * 2 + dj) * 64 + c * 4 + i * 2 + j
                for ci in range(6):
                    for kh in range(3):
                        for kw in range(3):
                            rows.append(ci * 36 + (oh + kh) * 6 + (ow + kw))
                            cols.append(p)
                            flat.append(((c * 6 + ci) * 3 + kh) * 3 + kw)
    vals = w.reshape(-1)[jnp.array(flat)].astype(jnp.float32)
    wd = jnp.zeros((256, 256), jnp.float32).at[jnp.array(rows), jnp.array(cols)].set(vals)
    bd = jnp.tile(jnp.repeat(b.astype(jnp.float32), 4), 4).reshape(1, 256)
    return wd, bd


def prepare_params(params):
    """Precompute all kernel-side weight layouts once (GEMM weights in bf16)."""
    bf = jnp.bfloat16
    w1, b1 = _conv1_as_dense(params["conv1_w"], params["conv1_b"])
    w2, b2 = _conv2_pool_as_dense(params["conv2_w"], params["conv2_b"])
    n_cls = params["fc3_b"].shape[0]
    # Lane-dense fc3: zero weight columns and -1e30 bias for the fake classes
    # so they softmax to exactly 0.
    f3w = jnp.zeros((32, OUT_PAD), jnp.float32).at[:, :n_cls].set(
        params["fc3_w"].T.astype(jnp.float32))
    f3b = jnp.full((1, OUT_PAD), -1e30, jnp.float32).at[0, :n_cls].set(
        params["fc3_b"].astype(jnp.float32))
    return {
        "w1": w1.astype(bf), "b1": b1,
        "w2": w2.astype(bf), "b2": b2,
        "f1w": params["fc1_w"].T.astype(bf),
        "f1b": params["fc1_b"].reshape(1, -1).astype(jnp.float32),
        "f2w": params["fc2_w"].T.astype(bf),
        "f2b": params["fc2_b"].reshape(1, -1).astype(jnp.float32),
        "f3w": f3w.astype(bf), "f3b": f3b,
    }


# ----------------------------------------------------------------------------
# pallas_call wrapper
# ----------------------------------------------------------------------------

def _round_up(x, m):
    return ((x + m - 1) // m) * m


@functools.partial(jax.jit, static_argnames=("n_classes", "max_tile_n"))
def cnn_forward(x, prep, *, n_classes, max_tile_n=1024):
    """x: (N, 1, 8, 8) float32 -> softmax probs (N, n_classes)."""
    n = x.shape[0]
    x_flat = x.reshape(n, 64).astype(jnp.bfloat16)        # Cin=1 -> flatten (H,W)

    # Tile policy: >=2 grid steps (keeps both v7x TCs busy under "parallel"),
    # per-tile padding at most 15 rows (16 = bf16 sublane packing granularity).
    n_tiles = max(2, -(-n // max_tile_n))
    tile_n = _round_up(-(-n // n_tiles), 16)
    n_pad = tile_n * n_tiles
    if n_pad != n:
        x_flat = jnp.pad(x_flat, ((0, n_pad - n), (0, 0)))

    def full_spec(arr):
        # Constant index_map -> fetched once, VMEM-resident across the grid.
        return pl.BlockSpec(arr.shape, lambda i: (0, 0))

    weight_keys = ("w1", "b1", "w2", "b2",
                   "f1w", "f1b", "f2w", "f2b", "f3w", "f3b")

    out = pl.pallas_call(
        _fused_cnn_kernel,
        out_shape=jax.ShapeDtypeStruct((n_pad, OUT_PAD), jnp.float32),
        grid=(n_tiles,),
        in_specs=[pl.BlockSpec((tile_n, 64), lambda i: (i, 0))]
                 + [full_spec(prep[k]) for k in weight_keys],
        out_specs=pl.BlockSpec((tile_n, OUT_PAD), lambda i: (i, 0)),
        compiler_params=pltpu.CompilerParams(
            dimension_semantics=("parallel",)),
    )(x_flat, *(prep[k] for k in weight_keys))

    return out[:n, :n_classes]


# ----------------------------------------------------------------------------
# Pure-JAX reference (for self-check) and deterministic init
# ----------------------------------------------------------------------------

def ref_forward(x, params):
    dn = ("NCHW", "OIHW", "NCHW")
    y = lax.conv_general_dilated(x, params["conv1_w"], (1, 1), "VALID",
                                 dimension_numbers=dn)
    y = jax.nn.relu(y + params["conv1_b"][None, :, None, None])
    y = lax.conv_general_dilated(y, params["conv2_w"], (1, 1), "VALID",
                                 dimension_numbers=dn)
    y = jax.nn.relu(y + params["conv2_b"][None, :, None, None])
    y = lax.reduce_window(y, -jnp.inf, lax.max, (1, 1, 2, 2), (1, 1, 2, 2), "VALID")
    y = y.reshape(y.shape[0], -1)
    y = jax.nn.relu(y @ params["fc1_w"].T + params["fc1_b"])
    y = jax.nn.relu(y @ params["fc2_w"].T + params["fc2_b"])
    y = y @ params["fc3_w"].T + params["fc3_b"]
    return jax.nn.softmax(y, axis=1)


def init_params(key, max_no_comp):
    ks = jax.random.split(key, 10)

    def unif(k, shape, fan_in):
        bound = 1.0 / math.sqrt(fan_in)
        return jax.random.uniform(k, shape, jnp.float32, -bound, bound)

    return {
        "conv1_w": unif(ks[0], (6, 1, 3, 3), 1 * 3 * 3),
        "conv1_b": unif(ks[1], (6,), 1 * 3 * 3),
        "conv2_w": unif(ks[2], (16, 6, 3, 3), 6 * 3 * 3),
        "conv2_b": unif(ks[3], (16,), 6 * 3 * 3),
        "fc1_w": unif(ks[4], (32, 64), 64),
        "fc1_b": unif(ks[5], (32,), 64),
        "fc2_w": unif(ks[6], (32, 32), 32),
        "fc2_b": unif(ks[7], (32,), 32),
        "fc3_w": unif(ks[8], (max_no_comp, 32), 32),
        "fc3_b": unif(ks[9], (max_no_comp,), 32),
    }


if __name__ == "__main__":
    MAX_NO_COMP = 5   # params['max_no_comp']
    key = jax.random.PRNGKey(0)
    kx, kp = jax.random.split(key)

    params = init_params(kp, MAX_NO_COMP)
    prep = prepare_params(params)

    # Input implied by fc1 (64 = 16ch * 2 * 2 after two valid 3x3 convs + pool):
    x = jax.random.normal(kx, (2, 1, 8, 8), jnp.float32)

    out = cnn_forward(x, prep, n_classes=MAX_NO_COMP)
    out = jax.block_until_ready(out)
    ref = jax.block_until_ready(ref_forward(x, params))

    assert out.shape == (2, MAX_NO_COMP), out.shape
    assert bool(jnp.all(jnp.isfinite(out)))
    assert bool(jnp.allclose(jnp.sum(out, axis=1), 1.0, atol=1e-4))
    assert bool(jnp.allclose(out, ref, atol=1e-2, rtol=2e-2))
    print("KERNEL_OK")
</pallas_src>

<mosaic_0001>
module attributes {stable_mosaic.version = 11 : i64} {
  func.func @_fused_cnn_kernel(%arg0: i32, %arg1: memref<16x64xbf16, #tpu.memory_space<vmem>>, %arg2: memref<64x256xbf16, #tpu.memory_space<vmem>>, %arg3: memref<1x256xf32, #tpu.memory_space<vmem>>, %arg4: memref<256x256xbf16, #tpu.memory_space<vmem>>, %arg5: memref<1x256xf32, #tpu.memory_space<vmem>>, %arg6: memref<64x32xbf16, #tpu.memory_space<vmem>>, %arg7: memref<1x32xf32, #tpu.memory_space<vmem>>, %arg8: memref<32x32xbf16, #tpu.memory_space<vmem>>, %arg9: memref<1x32xf32, #tpu.memory_space<vmem>>, %arg10: memref<32x128xbf16, #tpu.memory_space<vmem>>, %arg11: memref<1x128xf32, #tpu.memory_space<vmem>>, %arg12: memref<16x128xf32, #tpu.memory_space<vmem>>) attributes {dimension_semantics = [#tpu.dimension_semantics<parallel>], iteration_bounds = array<i64: 2>, scalar_prefetch = 0 : i64, scratch_operands = 0 : i64, tpu.core_type = #tpu.core_type<tc>, window_params = [{transform_indices = @transform_0, window_bounds = array<i64: 16, 64>}, {pipeline_mode = #tpu.pipeline_mode<synchronous>, transform_indices = @transform_1, window_bounds = array<i64: 64, 256>}, {pipeline_mode = #tpu.pipeline_mode<synchronous>, transform_indices = @transform_2, window_bounds = array<i64: 1, 256>}, {pipeline_mode = #tpu.pipeline_mode<synchronous>, transform_indices = @transform_3, window_bounds = array<i64: 256, 256>}, {pipeline_mode = #tpu.pipeline_mode<synchronous>, transform_indices = @transform_4, window_bounds = array<i64: 1, 256>}, {pipeline_mode = #tpu.pipeline_mode<synchronous>, transform_indices = @transform_5, window_bounds = array<i64: 64, 32>}, {pipeline_mode = #tpu.pipeline_mode<synchronous>, transform_indices = @transform_6, window_bounds = array<i64: 1, 32>}, {pipeline_mode = #tpu.pipeline_mode<synchronous>, transform_indices = @transform_7, window_bounds = array<i64: 32, 32>}, {pipeline_mode = #tpu.pipeline_mode<synchronous>, transform_indices = @transform_8, window_bounds = array<i64: 1, 32>}, {pipeline_mode = #tpu.pipeline_mode<synchronous>, transform_indices = @transform_9, window_bounds = array<i64: 32, 128>}, {pipeline_mode = #tpu.pipeline_mode<synchronous>, transform_indices = @transform_10, window_bounds = array<i64: 1, 128>}, {transform_indices = @transform_11, window_bounds = array<i64: 16, 128>}]} {
    %c0 = arith.constant 0 : index
    %c0_0 = arith.constant 0 : index
    %0 = vector.load %arg1[%c0, %c0_0] : memref<16x64xbf16, #tpu.memory_space<vmem>>, vector<16x64xbf16>
    %c0_1 = arith.constant 0 : index
    %c0_2 = arith.constant 0 : index
    %1 = vector.load %arg2[%c0_1, %c0_2] : memref<64x256xbf16, #tpu.memory_space<vmem>>, vector<64x256xbf16>
    %cst = arith.constant dense<0.000000e+00> : vector<16x256xf32>
    %2 = tpu.matmul %0, %1, %cst {dimension_numbers = #tpu.dot_dimension_numbers<[1], [0], [0], [1], [0, 0, 1, 1], [], []>} : vector<16x64xbf16>, vector<64x256xbf16>, vector<16x256xf32> -> vector<16x256xf32>
    %c0_3 = arith.constant 0 : index
    %c0_4 = arith.constant 0 : index
    %3 = vector.load %arg3[%c0_3, %c0_4] : memref<1x256xf32, #tpu.memory_space<vmem>>, vector<1x256xf32>
    %4 = vector.broadcast %3 : vector<1x256xf32> to vector<16x256xf32>
    %5 = arith.addf %2, %4 : vector<16x256xf32>
    %cst_5 = arith.constant 0.000000e+00 : f32
    %6 = vector.broadcast %cst_5 : f32 to vector<16x256xf32>
    %7 = arith.maximumf %5, %6 : vector<16x256xf32>
    %8 = arith.truncf %7 : vector<16x256xf32> to vector<16x256xbf16>
    %c0_6 = arith.constant 0 : index
    %c0_7 = arith.constant 0 : index
    %9 = vector.load %arg4[%c0_6, %c0_7] : memref<256x256xbf16, #tpu.memory_space<vmem>>, vector<256x256xbf16>
    %cst_8 = arith.constant dense<0.000000e+00> : vector<16x256xf32>
    %10 = tpu.matmul %8, %9, %cst_8 {dimension_numbers = #tpu.dot_dimension_numbers<[1], [0], [0], [1], [0, 0, 1, 1], [], []>} : vector<16x256xbf16>, vector<256x256xbf16>, vector<16x256xf32> -> vector<16x256xf32>
    %c0_9 = arith.constant 0 : index
    %c0_10 = arith.constant 0 : index
    %11 = vector.load %arg5[%c0_9, %c0_10] : memref<1x256xf32, #tpu.memory_space<vmem>>, vector<1x256xf32>
    %12 = vector.broadcast %11 : vector<1x256xf32> to vector<16x256xf32>
    %13 = arith.addf %10, %12 : vector<16x256xf32>
    %cst_11 = arith.constant 0.000000e+00 : f32
    %14 = vector.broadcast %cst_11 : f32 to vector<16x256xf32>
    %15 = arith.maximumf %13, %14 : vector<16x256xf32>
    %16 = vector.extract_strided_slice %15 {offsets = [0, 0], sizes = [16, 64], strides = [1, 1]} : vector<16x256xf32> to vector<16x64xf32>
    %17 = vector.extract_strided_slice %15 {offsets = [0, 64], sizes = [16, 64], strides = [1, 1]} : vector<16x256xf32> to vector<16x64xf32>
    %18 = arith.maximumf %16, %17 : vector<16x64xf32>
    %19 = vector.extract_strided_slice %15 {offsets = [0, 128], sizes = [16, 64], strides = [1, 1]} : vector<16x256xf32> to vector<16x64xf32>
    %20 = vector.extract_strided_slice %15 {offsets = [0, 192], sizes = [16, 64], strides = [1, 1]} : vector<16x256xf32> to vector<16x64xf32>
    %21 = arith.maximumf %19, %20 : vector<16x64xf32>
    %22 = arith.maximumf %18, %21 : vector<16x64xf32>
    %23 = arith.truncf %22 : vector<16x64xf32> to vector<16x64xbf16>
    %c0_12 = arith.constant 0 : index
    %c0_13 = arith.constant 0 : index
    %24 = vector.load %arg6[%c0_12, %c0_13] : memref<64x32xbf16, #tpu.memory_space<vmem>>, vector<64x32xbf16>
    %cst_14 = arith.constant dense<0.000000e+00> : vector<16x32xf32>
    %25 = tpu.matmul %23, %24, %cst_14 {dimension_numbers = #tpu.dot_dimension_numbers<[1], [0], [0], [1], [0, 0, 1, 1], [], []>} : vector<16x64xbf16>, vector<64x32xbf16>, vector<16x32xf32> -> vector<16x32xf32>
    %c0_15 = arith.constant 0 : index
    %c0_16 = arith.constant 0 : index
    %26 = vector.load %arg7[%c0_15, %c0_16] : memref<1x32xf32, #tpu.memory_space<vmem>>, vector<1x32xf32>
    %27 = vector.broadcast %26 : vector<1x32xf32> to vector<16x32xf32>
    %28 = arith.addf %25, %27 : vector<16x32xf32>
    %cst_17 = arith.constant 0.000000e+00 : f32
    %29 = vector.broadcast %cst_17 : f32 to vector<16x32xf32>
    %30 = arith.maximumf %28, %29 : vector<16x32xf32>
    %31 = arith.truncf %30 : vector<16x32xf32> to vector<16x32xbf16>
    %c0_18 = arith.constant 0 : index
    %c0_19 = arith.constant 0 : index
    %32 = vector.load %arg8[%c0_18, %c0_19] : memref<32x32xbf16, #tpu.memory_space<vmem>>, vector<32x32xbf16>
    %cst_20 = arith.constant dense<0.000000e+00> : vector<16x32xf32>
    %33 = tpu.matmul %31, %32, %cst_20 {dimension_numbers = #tpu.dot_dimension_numbers<[1], [0], [0], [1], [0, 0, 1, 1], [], []>} : vector<16x32xbf16>, vector<32x32xbf16>, vector<16x32xf32> -> vector<16x32xf32>
    %c0_21 = arith.constant 0 : index
    %c0_22 = arith.constant 0 : index
    %34 = vector.load %arg9[%c0_21, %c0_22] : memref<1x32xf32, #tpu.memory_space<vmem>>, vector<1x32xf32>
    %35 = vector.broadcast %34 : vector<1x32xf32> to vector<16x32xf32>
    %36 = arith.addf %33, %35 : vector<16x32xf32>
    %cst_23 = arith.constant 0.000000e+00 : f32
    %37 = vector.broadcast %cst_23 : f32 to vector<16x32xf32>
    %38 = arith.maximumf %36, %37 : vector<16x32xf32>
    %39 = arith.truncf %38 : vector<16x32xf32> to vector<16x32xbf16>
    %c0_24 = arith.constant 0 : index
    %c0_25 = arith.constant 0 : index
    %40 = vector.load %arg10[%c0_24, %c0_25] : memref<32x128xbf16, #tpu.memory_space<vmem>>, vector<32x128xbf16>
    %cst_26 = arith.constant dense<0.000000e+00> : vector<16x128xf32>
    %41 = tpu.matmul %39, %40, %cst_26 {dimension_numbers = #tpu.dot_dimension_numbers<[1], [0], [0], [1], [0, 0, 1, 1], [], []>} : vector<16x32xbf16>, vector<32x128xbf16>, vector<16x128xf32> -> vector<16x128xf32>
    %c0_27 = arith.constant 0 : index
    %c0_28 = arith.constant 0 : index
    %42 = vector.load %arg11[%c0_27, %c0_28] : memref<1x128xf32, #tpu.memory_space<vmem>>, vector<1x128xf32>
    %43 = vector.broadcast %42 : vector<1x128xf32> to vector<16x128xf32>
    %44 = arith.addf %41, %43 : vector<16x128xf32>
    %cst_29 = arith.constant dense<0xFF800000> : vector<16xf32>
    %45 = vector.multi_reduction <maximumf>, %44, %cst_29 [1] : vector<16x128xf32> to vector<16xf32>
    %46 = vector.shape_cast %45 : vector<16xf32> to vector<16x1xf32>
    %47 = vector.broadcast %46 : vector<16x1xf32> to vector<16x128xf32>
    %48 = arith.subf %44, %47 : vector<16x128xf32>
    %49 = math.exp %48 : vector<16x128xf32>
    %cst_30 = arith.constant dense<0.000000e+00> : vector<16xf32>
    %50 = vector.multi_reduction <add>, %49, %cst_30 [1] : vector<16x128xf32> to vector<16xf32>
    %51 = vector.shape_cast %50 : vector<16xf32> to vector<16x1xf32>
    %52 = vector.broadcast %51 : vector<16x1xf32> to vector<16x128xf32>
    %53 = arith.divf %49, %52 : vector<16x128xf32>
    %c0_31 = arith.constant 0 : index
    %c0_32 = arith.constant 0 : index
    %54 = vector.load %arg12[%c0_31, %c0_32] : memref<16x128xf32, #tpu.memory_space<vmem>>, vector<16x128xf32>
    tpu.vector_store %arg12[%c0_31, %c0_32], %53 {strides = array<i32>} : memref<16x128xf32, #tpu.memory_space<vmem>>, vector<16x128xf32>,
    return
  }
  func.func @transform_0(%arg0: i32) -> (i32, i32) {
    %c0_i32 = arith.constant 0 : i32
    %c0_i32_0 = arith.constant 0 : i32
    return %arg0, %c0_i32 : i32, i32
  }
  func.func @transform_1(%arg0: i32) -> (i32, i32) {
    %c0_i32 = arith.constant 0 : i32
    %c0_i32_0 = arith.constant 0 : i32
    %c0_i32_1 = arith.constant 0 : i32
    return %c0_i32, %c0_i32_0 : i32, i32
  }
  func.func @transform_2(%arg0: i32) -> (i32, i32) {
    %c0_i32 = arith.constant 0 : i32
    %c0_i32_0 = arith.constant 0 : i32
    %c0_i32_1 = arith.constant 0 : i32
    return %c0_i32, %c0_i32_0 : i32, i32
  }
  func.func @transform_3(%arg0: i32) -> (i32, i32) {
    %c0_i32 = arith.constant 0 : i32
    %c0_i32_0 = arith.constant 0 : i32
    %c0_i32_1 = arith.constant 0 : i32
    return %c0_i32, %c0_i32_0 : i32, i32
  }
  func.func @transform_4(%arg0: i32) -> (i32, i32) {
    %c0_i32 = arith.constant 0 : i32
    %c0_i32_0 = arith.constant 0 : i32
    %c0_i32_1 = arith.constant 0 : i32
    return %c0_i32, %c0_i32_0 : i32, i32
  }
  func.func @transform_5(%arg0: i32) -> (i32, i32) {
    %c0_i32 = arith.constant 0 : i32
    %c0_i32_0 = arith.constant 0 : i32
    %c0_i32_1 = arith.constant 0 : i32
    return %c0_i32, %c0_i32_0 : i32, i32
  }
  func.func @transform_6(%arg0: i32) -> (i32, i32) {
    %c0_i32 = arith.constant 0 : i32
    %c0_i32_0 = arith.constant 0 : i32
    %c0_i32_1 = arith.constant 0 : i32
    return %c0_i32, %c0_i32_0 : i32, i32
  }
  func.func @transform_7(%arg0: i32) -> (i32, i32) {
    %c0_i32 = arith.constant 0 : i32
    %c0_i32_0 = arith.constant 0 : i32
    %c0_i32_1 = arith.constant 0 : i32
    return %c0_i32, %c0_i32_0 : i32, i32
  }
  func.func @transform_8(%arg0: i32) -> (i32, i32) {
    %c0_i32 = arith.constant 0 : i32
    %c0_i32_0 = arith.constant 0 : i32
    %c0_i32_1 = arith.constant 0 : i32
    return %c0_i32, %c0_i32_0 : i32, i32
  }
  func.func @transform_9(%arg0: i32) -> (i32, i32) {
    %c0_i32 = arith.constant 0 : i32
    %c0_i32_0 = arith.constant 0 : i32
    %c0_i32_1 = arith.constant 0 : i32
    return %c0_i32, %c0_i32_0 : i32, i32
  }
  func.func @transform_10(%arg0: i32) -> (i32, i32) {
    %c0_i32 = arith.constant 0 : i32
    %c0_i32_0 = arith.constant 0 : i32
    %c0_i32_1 = arith.constant 0 : i32
    return %c0_i32, %c0_i32_0 : i32, i32
  }
  func.func @transform_11(%arg0: i32) -> (i32, i32) {
    %c0_i32 = arith.constant 0 : i32
    %c0_i32_0 = arith.constant 0 : i32
    return %arg0, %c0_i32 : i32, i32
  }
}

</mosaic_0001>

<bundles_post_ra>
// kernel: cnn_forward.1
= control target key start
LH: loop header
LB: loop body
LE: loop exit
PB: predicated region body
PF: predicated region fallthrough
CT: control target
= control target key end

     0   :  { %16 = vsyncpa [#allocation3], 0  ;;  %s1439_s17 = smov 0   ;;  %s1583_s0 = inlined_call_operand.vmem [shape: bf16[32,64], index: 0, kind: input, shape index: {}]   ;;  %s1584_s1 = inlined_call_operand.vmem [shape: bf16[64,256], index: 1, kind: input, shape index: {}]   ;;  %s1585_s2 = inlined_call_operand.vmem [shape: f32[1,256], index: 2, kind: input, shape index: {}]   ;;  %s1586_s3 = inlined_call_operand.hbm [shape: bf16[256,256], index: 3, kind: input, shape index: {}]   ;;  %s1587_s4 = inlined_call_operand.vmem [shape: f32[1,256], index: 4, kind: input, shape index: {}]   ;;  %s1588_s5 = inlined_call_operand.vmem [shape: bf16[64,32], index: 5, kind: input, shape index: {}]   ;;  %s1589_s6 = inlined_call_operand.vmem [shape: f32[1,32], index: 6, kind: input, shape index: {}]   ;;  %s1590_s7 = inlined_call_operand.vmem [shape: bf16[32,32], index: 7, kind: input, shape index: {}]   ;;  %s1591_s8 = inlined_call_operand.vmem [shape: f32[1,32], index: 8, kind: input, shape index: {}]   ;;  %s1592_s9 = inlined_call_operand.vmem [shape: bf16[32,128], index: 9, kind: input, shape index: {}]   ;;  %s1593_s10 = inlined_call_operand.vmem [shape: f32[1,128], index: 10, kind: input, shape index: {}]   ;;  %s1594_s11 = inlined_call_operand.vmem [shape: f32[32,128], index: 11, kind: output, shape index: {}]  }
   0x1 LB: > { %s1112_s18 = sadd.s32 4294967295, %s1370_s17   ;;  %p1114_p0 = scmp.ge.s32.totalorder %s1370_s17, 1  ;;  %s1370_s17 = sphi %s1439_s17, %s22_s17  }
   0x2   : > { %p289_p1 = scmp.lt.s32.totalorder %s1370_s17, 3  ;;  %s1372_s19 = smov [#allocation2]  }
   0x3   : > { %s307_s20 = sshll.u32 %s1372_s19, 4  ;;  %p1453_p3 = scmp.eq.s32.totalorder %s1112_s18, 0  ;;  %s308_s20 = int_to_ptr.vmem [resolvable:$true] %s307_s20 }
   0x4   : > { %p1447_p2 = pnand %p1114_p0, %p289_p1  ;;  %s1332_s26 = scalar_lea.hbm %s1586_s3, 4096 }
   0x5   : > { %s1599_s22 = scalar_select %p1453_p3, 1, 0 }
   0x6   : > { %s1598_s21 = scalar_select %p1447_p2, 1, 0 }
   0x7   : > { %p1224_p4 = pneg %p1447_p2  ;;  %p1333_p6 = scmp.ne.s32.totalorder %s1586_s3, %s1332_s26 }
   0x8   : > { %p1339_p10 = scmp.lt.u32.totalorder %s1332_s26, %s1586_s3 }
   0x9   : > { %p1461_p5 = pnand %p1453_p3, %p1224_p4 }
   0xb   : > { %p1334_p7 = pneg %p1461_p5 }
   0xd   : > { %p1335_p8 = pnand %p1334_p7, %p1333_p6 }
   0xf   : > { %p1336_p9 = pneg %p1335_p8 }
  0x11   : > { %p1341_p11 = pnand %p1339_p10, %p1336_p9 }
  0x13   : > { %1344 = shalt.err (!%p1341_p11)
}
  0x14   : > { %s1345_s12 = scalar_lea.vmem %s308_s20, 4096  ;;  %p1353_p1 = scmp.lt.s32.totalorder %s308_s20, %s308_s20 }
  0x15   : > { %p1346_p12 = scmp.ne.s32.totalorder %s308_s20, %s1345_s12  ;;  %p1354_p4 = scmp.lt.s32.totalorder %s1345_s12, %s1345_s12 }
  0x17   : > { %p1348_p13 = pnand %p1346_p12, %p1334_p7  ;;  %p1355_p3 = por %p1354_p4, %p1353_p1 }
  0x19   : > { %p1349_p0 = pneg %p1348_p13 }
  0x1b   : > { %p1356_p2 = pnand %p1355_p3, %p1349_p0 }
  0x1d   : > { %1359 = shalt.err (!%p1356_p2)
}
  0x1e   : > { %s1373_s13 = smov 128   ;;  %s1374_s14 = smov 8  }
  0x1f   : > { %1227 = dma.hbm_to_vmem [thread:$0]  (!%p1461_p5), %s1586_s3, 4096, %s308_s20, [#allocation3], %s1373_s13, %s1373_s13, %s1374_s14  }
  0x20   : > { %p1601_p6 = scmp.ne.s32.totalorder %s1598_s21, 0 }
  0x21   : > { %p1602_p8 = scmp.ne.s32.totalorder (!%p1601_p6), %s1599_s22, 0 }
  0x22   : > { %353 = sbr.rel (%p1601_p6) target bundleno = 1599 (0x63f), region = 64 }
  0x29   : > { %1365 = dma.done.wait (%p1602_p8), [#allocation3], 4096  }
  0x2a   : > { %1367 = vsyncadd (%p1602_p8), [#allocation3], 4294963200  ;;  %s1119_s19 = sshll.u32 %s1112_s18, 1  ;;  %v1375_v0 = vmov 0   ;;  %v1255_v1 = vld [vmem:[%s1584_s1 + $0x4] ss:$8 sps:$4 sm:$0xff]   ;;  %v418_v42 = vlaneseq }
  0x2b   : > { %509 = vmatprep.mubr.bf16.mxu0 %v1375_v0  ;;  %p394_p2 = scmp.lt.s32.totalorder %s1119_s19, 3  ;;  %v1257_v2 = vld [vmem:[%s1584_s1] ss:$8 sps:$4 sm:$0xff]   ;;  %477 = vmatprep.subr.bf16.mxu0 %v1255_v1  ;;  %v1258_v3 = vld [vmem:[%s1584_s1 + $0x14] ss:$8 sps:$4 sm:$0xff]   ;;  %vm473_vm0 = vcmask 523264  }
  0x2c   : > { %478 = vmatpush1.bf16.msra.mxu0 %v1257_v2  ;;  %v1260_v4 = vld [vmem:[%s1584_s1 + $0x10] ss:$8 sps:$4 sm:$0xff]   ;;  %v1261_v5 = vld [vmem:[%s1584_s1 + $0x24] ss:$8 sps:$4 sm:$0xff]   ;;  %v1263_v6 = vld [vmem:[%s1584_s1 + $0x20] ss:$8 sps:$4 sm:$0xff]  }
  0x2d   : > { %s1604_s19 = smov (!%p394_p2, %s1119_s19), 3  ;;  %479 = vmatprep.subr.bf16.mxu0 %v1258_v3  ;;  %v1268_v7 = vld [vmem:[#allocation2 + $0x4] ss:$8 sps:$4 sm:$0xff]   ;;  %v1270_v8 = vld [vmem:[#allocation2] ss:$8 sps:$4 sm:$0xff]   ;;  %v419_v43 = vshrl.u32 %v418_v42, 7 }
  0x2e   : > { %s1120_s25 = sshll.u32 %s1604_s19, 2  ;;  %v1264_v9 = vld [vmem:[%s1584_s1 + $0x34] ss:$8 sps:$4 sm:$0xff]   ;;  %730 = vmatprep.subr.bf16.mxu1 %v1268_v7  ;;  %v1273_v11 = vld [vmem:[#allocation2 + $0x10] ss:$8 sps:$4 sm:$0xff]   ;;  %v1316_v63 = vld [vmem:[%s1588_s5] sm:$0xff]  }
  0x2f   : > { %s397_s13 = scalar_lea.vmem %s1583_s0, %s1120_s25  ;;  %v1271_v10 = vld [vmem:[#allocation2 + $0x14] ss:$8 sps:$4 sm:$0xff]   ;;  %731 = vmatpush1.bf16.msra.mxu1 %v1270_v8  ;;  %v1266_v12 = vld [vmem:[%s1584_s1 + $0x30] ss:$8 sps:$4 sm:$0xff]   ;;  %v1274_v13 = vld [vmem:[#allocation2 + $0x24] ss:$8 sps:$4 sm:$0xff]  }
  0x30   : > { %480 = vmatpush1.bf16.msra.mxu0 %v1260_v4  ;;  %732 = vmatprep.subr.bf16.mxu1 %v1271_v10  ;;  %v1267_v14 = vld [vmem:[%s397_s13] sm:$0xff]   ;;  %v1277_v16 = vld [vmem:[#allocation2 + $0x34] ss:$8 sps:$4 sm:$0xff]   ;;  %v1279_v17 = vld [vmem:[#allocation2 + $0x30] ss:$8 sps:$4 sm:$0xff]   ;;  %v420_v44 = vsub.s32 0, %v419_v43 }
  0x31   : > { %481 = vmatprep.subr.bf16.mxu0 %v1261_v5  ;;  %v1276_v15 = vld [vmem:[#allocation2 + $0x20] ss:$8 sps:$4 sm:$0xff]   ;;  %v1280_v18 = vld [vmem:[#allocation2 + $0x44] ss:$8 sps:$4 sm:$0xff]   ;;  %v1283_v20 = vld [vmem:[#allocation2 + $0x54] ss:$8 sps:$4 sm:$0xff]  }
  0x32   : > { %v1282_v19 = vld [vmem:[#allocation2 + $0x40] ss:$8 sps:$4 sm:$0xff]   ;;  %v1285_v21 = vld [vmem:[#allocation2 + $0x50] ss:$8 sps:$4 sm:$0xff]   ;;  %v1286_v22 = vld [vmem:[#allocation2 + $0x64] ss:$8 sps:$4 sm:$0xff]  }
  0x33   : > { %733 = vmatpush1.bf16.msra.mxu1 %v1273_v11  ;;  %v1288_v23 = vld [vmem:[#allocation2 + $0x60] ss:$8 sps:$4 sm:$0xff]   ;;  %v1289_v24 = vld [vmem:[#allocation2 + $0x74] ss:$8 sps:$4 sm:$0xff]   ;;  %v1291_v25 = vld [vmem:[#allocation2 + $0x70] ss:$8 sps:$4 sm:$0xff]  }
  0x34   : > { %482 = vmatpush1.bf16.msra.mxu0 %v1263_v6  ;;  %734 = vmatprep.subr.bf16.mxu1 %v1274_v13  ;;  %v1292_v26 = vld [vmem:[#allocation2 + $0x84] ss:$8 sps:$4 sm:$0xff]   ;;  %v1294_v27 = vld [vmem:[#allocation2 + $0x80] ss:$8 sps:$4 sm:$0xff]   ;;  %v1295_v28 = vld [vmem:[#allocation2 + $0x94] ss:$8 sps:$4 sm:$0xff]  }
  0x35   : > { %483 = vmatprep.subr.bf16.mxu0 %v1264_v9  ;;  %v1297_v29 = vld [vmem:[#allocation2 + $0x90] ss:$8 sps:$4 sm:$0xff]   ;;  %v1298_v30 = vld [vmem:[#allocation2 + $0xa4] ss:$8 sps:$4 sm:$0xff]   ;;  %v1300_v31 = vld [vmem:[#allocation2 + $0xa0] ss:$8 sps:$4 sm:$0xff]  }
  0x36   : > { %v1301_v32 = vld [vmem:[#allocation2 + $0xb4] ss:$8 sps:$4 sm:$0xff]   ;;  %v1303_v33 = vld [vmem:[#allocation2 + $0xb0] ss:$8 sps:$4 sm:$0xff]   ;;  %v1304_v34 = vld [vmem:[#allocation2 + $0xc4] ss:$8 sps:$4 sm:$0xff]  }
  0x37   : > { %735 = vmatpush1.bf16.msra.mxu1 %v1276_v15  ;;  %v1306_v35 = vld [vmem:[#allocation2 + $0xc0] ss:$8 sps:$4 sm:$0xff]   ;;  %v1307_v36 = vld [vmem:[#allocation2 + $0xd4] ss:$8 sps:$4 sm:$0xff]   ;;  %v1309_v37 = vld [vmem:[#allocation2 + $0xd0] ss:$8 sps:$4 sm:$0xff]  }
  0x38   : > { %484 = vmatpush1.bf16.msra.mxu0 %v1266_v12  ;;  %736 = vmatprep.subr.bf16.mxu1 %v1277_v16  ;;  %v1310_v38 = vld [vmem:[#allocation2 + $0xe4] ss:$8 sps:$4 sm:$0xff]   ;;  %v1312_v39 = vld [vmem:[#allocation2 + $0xe0] ss:$8 sps:$4 sm:$0xff]   ;;  %v1313_v40 = vld [vmem:[#allocation2 + $0xf4] ss:$8 sps:$4 sm:$0xff]  }
  0x39   : > { %v1315_v41 = vld [vmem:[#allocation2 + $0xf0] ss:$8 sps:$4 sm:$0xff]   ;;  %v416_v45 = vld [vmem:[%s1585_s2] sm:$0x3]  ;;  %v424_v46 = vsub.s32 1, %v419_v43  ;;  %v1376_v0 = vmov 0.0  }
  0x3a   : > { %v421_v47 = vrot.slane %v416_v45, %v420_v44  ;;  %1192 = vmatprep.subr.bf16.mxu0 %v1376_v0  ;;  %v558_v1 = vld [vmem:[%s1587_s4] sm:$0x3]  ;;  %v1317_v2 = vld [vmem:[%s1588_s5 + $0x8] sm:$0xff]   ;;  %v1318_v4 = vld [vmem:[%s1588_s5 + $0x10] sm:$0xff]   ;;  %vm1377_vm1 = vmmov 0   ;;  %s1378_s15 = smov 64  }
  0x3b   : > { %1132 = vmatmul.mubr.msk.bf16.vlgmr.msra.gmra.mrb[0].mxu0 %vm473_vm0, %v1267_v14  ;;  %737 = vmatpush1.bf16.msra.mxu1 %v1279_v17  ;;  %v425_v48 = vrot.slane %v416_v45, %v424_v46  ;;  %v563_v3 = vrot.slane %v558_v1, %v420_v44  ;;  %v567_v7 = vrot.slane %v558_v1, %v424_v46  ;;  %v1319_v12 = vld [vmem:[%s1588_s5 + $0x18] sm:$0xff]   ;;  %vm909_vm2 = vcmask 261120   ;;  %v1322_v46 = vld [vmem:[%s1592_s9] sm:$0xff]   ;;  %s1122_s13 = sshll.u32 %s1604_s19, 3 }
  0x3c   : > { %738 = vmatprep.subr.bf16.mxu1 %v1280_v18  ;;  %1193 = vmatpush3.bf16.msra.mxu0 %v1316_v63  ;;  %s403_s16 = scalar_lea.vmem %s1594_s11, %s1122_s13 }
  0x3d   : > { %1194 = vmatprep.subr.bf16.mxu0 %v1376_v0  ;;  %1200 = vmatprep.mubr.msk.bf16.mxu0 %vm1377_vm1, %v1376_v0 }
  0x3f   : > { %739 = vmatpush1.bf16.msra.mxu1 %v1282_v19 }
  0x40   : > { %740 = vmatprep.subr.bf16.mxu1 %v1283_v20  ;;  %1195 = vmatpush3.bf16.msra.mxu0 %v1317_v2 }
  0x41   : > { %1196 = vmatprep.subr.bf16.mxu0 %v1376_v0 }
  0x43   : > { %741 = vmatpush1.bf16.msra.mxu1 %v1285_v21 }
  0x44   : > { %742 = vmatprep.subr.bf16.mxu1 %v1286_v22  ;;  %1197 = vmatpush3.bf16.msra.mxu0 %v1318_v4 }
  0x45   : > { %1198 = vmatprep.subr.bf16.mxu0 %v1376_v0 }
  0x47   : > { %743 = vmatpush1.bf16.msra.mxu1 %v1288_v23 }
  0x48   : > { %744 = vmatprep.subr.bf16.mxu1 %v1289_v24  ;;  %1199 = vmatpush3.bf16.msra.mxu0 %v1319_v12 }
  0x49   : > { %1204 = vmatprep.subr.bf16.mxu0 %v1376_v0 }
  0x4b   : > { %745 = vmatpush1.bf16.msra.mxu1 %v1291_v25 }
  0x4c   : > { %746 = vmatprep.subr.bf16.mxu1 %v1292_v26 }
  0x4f   : > { %747 = vmatpush1.bf16.msra.mxu1 %v1294_v27 }
  0x50   : > { %748 = vmatprep.subr.bf16.mxu1 %v1295_v28 }
  0x53   : > { %749 = vmatpush1.bf16.msra.mxu1 %v1297_v29 }
  0x54   : > { %750 = vmatprep.subr.bf16.mxu1 %v1298_v30 }
  0x57   : > { %751 = vmatpush1.bf16.msra.mxu1 %v1300_v31 }
  0x58   : > { %752 = vmatprep.subr.bf16.mxu1 %v1301_v32 }
  0x5b   : > { %753 = vmatpush1.bf16.msra.mxu1 %v1303_v33 }
  0x5c   : > { %754 = vmatprep.subr.bf16.mxu1 %v1304_v34  ;;  %v1320_v34 = vld [vmem:[%s1590_s7] sm:$0xff]  }
  0x5f   : > { %755 = vmatpush1.bf16.msra.mxu1 %v1306_v35  ;;  %v1321_v35 = vld [vmem:[%s1590_s7 + $0x8] sm:$0xff]  }
  0x60   : > { %756 = vmatprep.subr.bf16.mxu1 %v1307_v36  ;;  %v1165_v36 = vld [vmem:[%s1589_s6] ss:$0 sm:$0xff] }
  0x63   : > { %757 = vmatpush1.bf16.msra.mxu1 %v1309_v37 }
  0x64   : > { %758 = vmatprep.subr.bf16.mxu1 %v1310_v38 }
  0x67   : > { %759 = vmatpush1.bf16.msra.mxu1 %v1312_v39 }
  0x68   : > { %760 = vmatprep.subr.bf16.mxu1 %v1313_v40 }
  0x6b   : > { %761 = vmatpush1.bf16.msra.mxu1 %v1315_v41 }
 0x10e   : > { %v511_v49 = vpop.f32.mrb[0].mxu0 }
 0x10f   : > { %v512_v50 = vadd.f32 %v511_v49, %v421_v47  ;;  %v513_v51 = vpop.f32.mrb[1].mxu0 }
 0x110   : > { %v514_v52 = vadd.f32 %v513_v51, %v425_v48  ;;  %v515_v53 = vpop.f32.mrb[2].mxu0 }
 0x111   : > { %v516_v54 = vadd.f32 %v515_v53, %v421_v47  ;;  %v517_v55 = vpop.f32.mrb[3].mxu0  ;;  %v520_v57 = vmax.f32 %v512_v50, 0.0  ;;  %v1323_v47 = vld [vmem:[%s1592_s9 + $0x8] sm:$0xff]  }
 0x112   : > { %v518_v56 = vadd.f32 %v517_v55, %v425_v48  ;;  %v521_v59 = vmax.f32 %v514_v52, 0.0  ;;  %v1171_v48 = vld [vmem:[%s1591_s8] ss:$0 sm:$0xff] }
 0x113   : > { %v522_v58 = vmax.f32 %v516_v54, 0.0 }
 0x114   : > { %v523_v60 = vmax.f32 %v518_v56, 0.0 }
 0x115   : > { %v524_v61 = vpack.c.bf16 %v522_v58, %v520_v57  ;;  %v1175_v58 = vld [vmem:[%s1593_s10] ss:$0 sm:$0xff] }
 0x116   : > { %v525_v62 = vpack.c.bf16 %v523_v60, %v521_v59 }
 0x118   : > { %762 = vmatprep.mubr.bf16.mxu1 %v525_v62 }
 0x119   : > { %763 = vmatmul.mubr.bf16.vlgmr.msra.gmra.mrb[0].mxu1 %v524_v61 }
 0x1ec   : > { %v764_v5 = vpop.f32.mrb[0].mxu1 }
 0x1ed   : > { %v765_v6 = vadd.f32 %v764_v5, %v563_v3  ;;  %v766_v8 = vpop.f32.mrb[1].mxu1 }
 0x1ee   : > { %v768_v9 = vpop.f32.mrb[2].mxu1  ;;  %v767_v15 = vadd.f32 %v766_v8, %v567_v7 }
 0x1ef   : > { %v769_v10 = vadd.f32 %v768_v9, %v563_v3  ;;  %v770_v11 = vpop.f32.mrb[3].mxu1  ;;  %v773_v14 = vmax.f32 %v765_v6, 0.0 }
 0x1f0   : > { %v771_v13 = vadd.f32 %v770_v11, %v567_v7  ;;  %v774_v19 = vmax.f32 %v767_v15, 0.0 }
 0x1f1   : > { %v775_v16 = vmax.f32 %v769_v10, 0.0 }
 0x1f2   : > { %v776_v17 = vmax.f32 %v771_v13, 0.0 }
 0x1f3   : > { %v1245_v18 = vpack.i.bf16 %v775_v16, %v773_v14 }
 0x1f4   : > { %v1250_v20 = vpack.i.bf16 %v776_v17, %v774_v19 }
 0x1f5   : > { %1246 = vrot.lane.b32.xlu0 %v1245_v18, %s1378_s15 }
 0x1f9   : > { %1251 = vrot.lane.b32.xlu0 %v1250_v20, %s1378_s15 }
 0x267   : > { %v1247_v21 = vpop.permute.xlu0 %1246 }
 0x268   : > { %v1249_v22 = vunpack.i.h.bf16 %v1247_v21  ;;  %v1248_v23 = vunpack.i.l.bf16 %v1247_v21 }
 0x26a   : > { %v786_v27 = vmax.f32 %v775_v16, %v1249_v22  ;;  %v785_v28 = vmax.f32 %v773_v14, %v1248_v23 }
 0x26b   : > { %v1252_v24 = vpop.permute.xlu0 %1251 }
 0x26c   : > { %v1254_v25 = vunpack.i.h.bf16 %v1252_v24  ;;  %v1253_v26 = vunpack.i.l.bf16 %v1252_v24 }
 0x26e   : > { %v796_v29 = vmax.f32 %v776_v17, %v1254_v25  ;;  %v795_v30 = vmax.f32 %v774_v19, %v1253_v26 }
 0x270   : > { %v797_v31 = vmax.f32 %v785_v28, %v795_v30  ;;  %v798_v32 = vmax.f32 %v786_v27, %v796_v29 }
 0x272   : > { %v799_v33 = vpack.c.bf16 %v798_v32, %v797_v31 }
 0x274   : > { %1201 = vmatmul.mubr.msk.bf16.vlgmr.msra.gmra.mrb[4].mxu0 %vm473_vm0, %v799_v33 }
 0x275   : > { %1208 = vmatprep.mubr.msk.bf16.mxu0 %vm1377_vm1, %v1376_v0  ;;  %1205 = vmatpush3.bf16.msra.mxu0 %v1320_v34 }
 0x276   : > { %1206 = vmatprep.subr.bf16.mxu0 %v1376_v0 }
 0x279   : > { %1207 = vmatpush3.bf16.msra.mxu0 %v1321_v35 }
 0x27a   : > { %1212 = vmatprep.subr.bf16.mxu0 %v1376_v0 }
 0x347   : > { %v876_v37 = vpop.f32.mrb[4].mxu0 }
 0x348   : > { %v877_v38 = vadd.f32 %v1165_v36, %v876_v37  ;;  %v1202_v39 = vpop.f32.mrb[5].mxu0 }
 0x349   : > { %v879_v40 = vpop.f32.mrb[6].mxu0 }
 0x34a   : > { %v880_v41 = vadd.f32 %v1165_v36, %v879_v40  ;;  %v1203_v42 = vpop.f32.mrb[7].mxu0  ;;  %v883_v43 = vmax.f32 %v877_v38, 0.0 }
 0x34c   : > { %v884_v44 = vmax.f32 %v880_v41, 0.0 }
 0x34e   : > { %v885_v45 = vpack.c.bf16 %v884_v44, %v883_v43 }
 0x350   : > { %1209 = vmatmul.mubr.msk.bf16.vlgmr.msra.gmra.mrb[8].mxu0 %vm909_vm2, %v885_v45 }
 0x351   : > { %1216 = vmatprep.mubr.msk.bf16.mxu0 %vm1377_vm1, %v1376_v0  ;;  %1213 = vmatpush3.bf16.msra.mxu0 %v1322_v46 }
 0x352   : > { %1214 = vmatprep.subr.bf16.mxu0 %v1376_v0 }
 0x355   : > { %1215 = vmatpush3.bf16.msra.mxu0 %v1323_v47 }
 0x423   : > { %v947_v49 = vpop.f32.mrb[8].mxu0 }
 0x424   : > { %v948_v50 = vadd.f32 %v1171_v48, %v947_v49  ;;  %v1210_v51 = vpop.f32.mrb[9].mxu0 }
 0x425   : > { %v950_v52 = vpop.f32.mrb[10].mxu0 }
 0x426   : > { %v951_v53 = vadd.f32 %v1171_v48, %v950_v52  ;;  %v1211_v54 = vpop.f32.mrb[11].mxu0  ;;  %v954_v55 = vmax.f32 %v948_v50, 0.0 }
 0x428   : > { %v955_v56 = vmax.f32 %v951_v53, 0.0 }
 0x42a   : > { %v956_v57 = vpack.c.bf16 %v955_v56, %v954_v55 }
 0x42c   : > { %1217 = vmatmul.mubr.msk.bf16.vlgmr.msra.gmra.mrb[12].mxu0 %vm909_vm2, %v956_v57 }
 0x4ff   : > { %v1017_v59 = vpop.f32.mrb[12].mxu0 }
 0x500   : > { %v1018_v60 = vadd.f32 %v1175_v58, %v1017_v59  ;;  %v1218_v61 = vpop.f32.mrb[13].mxu0 }
 0x501   : > { %v1020_v62 = vpop.f32.mrb[14].mxu0 }
 0x502   : > { %1024 = vmax.xlane.f32.xlu1 %v1018_v60  ;;  %v1219_v63 = vpop.f32.mrb[15].mxu0  ;;  %v1021_v0 = vadd.f32 %v1175_v58, %v1020_v62 }
 0x506   : > { %1026 = vmax.xlane.f32.xlu1 %v1021_v0 }
 0x58f   : > { %v1025_v1 = vpop.xlane.xlu1 %1024 }
 0x590   : > { %v1028_v2 = vsub.f32 %v1018_v60, %v1025_v1 }
 0x592   : > { %v1030_v3 = vmul.f32 1.442695, %v1028_v2 }
 0x593   : > { %v1027_v4 = vpop.xlane.xlu1 %1026 }
 0x594   : > { %1324 = vpow2.f32 %v1030_v3  ;;  %v1029_v5 = vsub.f32 %v1021_v0, %v1027_v4 }
 0x596   : > { %v1032_v6 = vmul.f32 1.442695, %v1029_v5 }
 0x598   : > { %1326 = vpow2.f32 %v1032_v6 }
 0x59e   : > { %v1325_v7 = vpop.eup %1324 }
 0x59f   : > { %1034 = vadd.xlane.f32.xlu0 %v1325_v7 }
 0x5a2   : > { %v1327_v8 = vpop.eup %1326 }
 0x5a3   : > { %1036 = vadd.xlane.f32.xlu1 %v1327_v8 }
 0x62c   : > { %v1035_v9 = vpop.xlane.xlu0 %1034 }
 0x62d   : > { %1328 = vrcp.f32 %v1035_v9 }
 0x630   : > { %v1037_v10 = vpop.xlane.xlu1 %1036 }
 0x631   : > { %1330 = vrcp.f32 %v1037_v10 }
 0x637   : > { %v1329_v11 = vpop.eup %1328 }
 0x638   : > { %v1039_v12 = vmul.f32 %v1329_v11, %v1325_v7 }
 0x63a   : > { %1042 = vst [vmem:[%s403_s16] sm:$0xff] %v1039_v12 }
 0x63b   : > { %v1331_v13 = vpop.eup %1330 }
 0x63c   : > { %v1041_v14 = vmul.f32 %v1331_v13, %v1327_v8 }
 0x63e   : > { %1043 = vst [vmem:[%s403_s16 + $0x8] sm:$0xff] %v1041_v14 }
 0x63f PF: > { %s22_s17 = sadd.s32 1, %s1370_s17  }
 0x640   : > { %p19_p3 = scmp.ge.s32.totalorder %s22_s17, 4  }
 0x642   :  { %21 = sbr.rel (!%p19_p3) target bundleno = 1 (0x1), region = 99 }
 0x649   :  { %1066 = vsyncpa [#allocation3], 1 }
 0x64a   :  { %1068 = vsyncpa [#allocation3 + $0x1], 1 }

</bundles_post_ra>
